<compile_context>
chip_gen: v7x
topology: tpu7x:2x2x1
jax: 0.10.0
libtpu: 0.0.40
codegen_flags: <defaults>
</compile_context>

<pallas_src>
import functools
import math

import jax
import jax.numpy as jnp
from jax.experimental import pallas as pl
from jax.experimental.pallas import tpu as pltpu


# ----------------------------------------------------------------------------
# Pallas attention kernel (native NCL layout, head-batched)
# ----------------------------------------------------------------------------
def _attn_kernel(q_ref, k_ref, v_ref, o_ref, *, scale):
    """One grid step: attention for a tile of heads in (H_TILE, C, L) layout."""
    q = q_ref[...] * scale           # fold 1/sqrt(C) into q     (H, C, Lq)
    k = k_ref[...]                   # (H, C, Lk)
    v = v_ref[...]                   # (H, C, Lk)

    # s[h, lq, lk] = sum_c q[h, c, lq] * k[h, c, lk]
    # (contract over C, batch over heads; no explicit k transpose)
    s = jax.lax.dot_general(
        q, k,
        dimension_numbers=(((1,), (1,)), ((0,), (0,))),
        preferred_element_type=jnp.float32,
    )                                # (H, Lq, Lk) f32

    # Numerically-stable softmax over the key axis; normalization deferred.
    m = jnp.max(s, axis=-1, keepdims=True)       # (H, Lq, 1)
    p = jnp.exp(s - m)                           # (H, Lq, Lk), unnormalized
    denom = jnp.sum(p, axis=-1)                  # (H, Lq)

    # out[h, c, lq] = sum_lk v[h, c, lk] * p[h, lq, lk]
    out = jax.lax.dot_general(
        v, p.astype(v.dtype),
        dimension_numbers=(((2,), (2,)), ((0,), (0,))),
        preferred_element_type=jnp.float32,
    )                                # (H, C, Lq) f32

    # Normalize after the PV matmul: O(L) reciprocals + O(C*L) multiplies
    # instead of an O(L^2) divide. (approx=True would move this onto the EUP
    # slot; kept exact here so the self-check can use a tight tolerance.)
    inv = pl.reciprocal(denom, approx=False)     # (H, Lq)
    o_ref[...] = (out * inv[:, None, :]).astype(o_ref.dtype)


def _pick_head_tile(bh, max_tile=8):
    # Batch up to `max_tile` heads per grid step (amortizes ~0.35us/step
    # overhead and gives the MXU back-to-back work), while keeping >= 2 grid
    # steps when possible so both v7x TensorCores get work.
    cap = min(max_tile, max(1, bh // 2))
    tile = 1
    for d in range(1, cap + 1):
        if bh % d == 0:
            tile = d
    return tile


# TODO(synk): add a flash-style L-tiled online-softmax path (grid over
# (BH, L/tq, L/tk) with m/l/acc VMEM scratch) for very long sequences; the
# full (L, L) score tile does not fit v7x's 64 MiB VMEM for L >~ 2K.
def _attention_pallas(q, k, v):
    """q, k, v: (BH, C, L) in native NCL layout -> out (BH, C, L)."""
    BH, C, L = q.shape
    h_tile = _pick_head_tile(BH)
    grid = (BH // h_tile,)
    spec = pl.BlockSpec((h_tile, C, L), lambda b: (b, 0, 0))
    kernel = functools.partial(_attn_kernel, scale=1.0 / math.sqrt(C))
    return pl.pallas_call(
        kernel,
        out_shape=jax.ShapeDtypeStruct((BH, C, L), q.dtype),
        grid_spec=pltpu.PrefetchScalarGridSpec(
            num_scalar_prefetch=0,
            grid=grid,
            in_specs=[spec, spec, spec],
            out_specs=spec,
        ),
        compiler_params=pltpu.CompilerParams(
            dimension_semantics=("parallel",),
            # Above the 16/32 MiB scoped defaults, below v7x's 64 MiB physical
            # VMEM; raise further on v5e/v6e when using large L / head tiles.
            vmem_limit_bytes=48 * 1024 * 1024,
        ),
    )(q, k, v)


def qkv_attention(qkv, n_heads):
    """JAX/Pallas equivalent of QKVAttention.forward.

    qkv: (bs, width, length) with width = 3 * n_heads * ch
    returns: (bs, n_heads * ch, length)
    """
    bs, width, length = qkv.shape
    assert width % (3 * n_heads) == 0
    ch = width // (3 * n_heads)

    # (bs, width, L) -> (bs*n_heads, 3*ch, L); split; stay in NCL layout
    # (no transposes: the kernel contracts over the channel dim directly).
    x = qkv.reshape(bs * n_heads, 3 * ch, length)
    q = x[:, 0 * ch:1 * ch, :]
    k = x[:, 1 * ch:2 * ch, :]
    v = x[:, 2 * ch:3 * ch, :]

    out = _attention_pallas(q, k, v)                  # (BH, ch, L)
    return out.reshape(bs, n_heads * ch, length)


# ----------------------------------------------------------------------------
# AttentionBlock glue (GroupNorm + 1x1 convs + residual) in plain JAX
# ----------------------------------------------------------------------------
def group_norm(x, gamma, beta, num_groups=32, eps=1e-5):
    # x: (B, C, L) — matches torch.nn.GroupNorm(num_groups, C)
    b, c, l = x.shape
    xg = x.reshape(b, num_groups, c // num_groups, l).astype(jnp.float32)
    mean = jnp.mean(xg, axis=(2, 3), keepdims=True)
    var = jnp.var(xg, axis=(2, 3), keepdims=True)
    xn = ((xg - mean) * jax.lax.rsqrt(var + eps)).reshape(b, c, l)
    return (xn * gamma[None, :, None] + beta[None, :, None]).astype(x.dtype)


def conv1x1(x, w, b):
    # 1x1 Conv1d: x (B, Cin, L), w (Cout, Cin), b (Cout,)
    return jnp.einsum("oc,bcl->bol", w, x) + b[None, :, None]


def attention_block_forward(x, cond, params, num_heads=1):
    b, c = x.shape[0], x.shape[1]
    xf = x.reshape(b, c, -1)
    cf = cond.reshape(b, c, -1)
    kv = conv1x1(cf, params["to_kv_w"], params["to_kv_b"])
    q = conv1x1(group_norm(xf, params["norm_w"], params["norm_b"]),
                params["to_q_w"], params["to_q_b"])
    qkv = jnp.concatenate([q, kv], axis=1)            # (b, 3c, L)
    h = qkv_attention(qkv, num_heads)                 # Pallas kernel
    h = conv1x1(h, params["proj_w"], params["proj_b"])
    return (xf + h).reshape(x.shape)


# ----------------------------------------------------------------------------
# Pure-JAX references
# ----------------------------------------------------------------------------
def _qkv_attention_ref(qkv, n_heads):
    bs, width, length = qkv.shape
    ch = width // (3 * n_heads)
    x = qkv.reshape(bs * n_heads, 3 * ch, length).astype(jnp.float32)
    q, k, v = x[:, :ch], x[:, ch:2 * ch], x[:, 2 * ch:]
    s = jnp.einsum("bcq,bck->bqk", q, k) / math.sqrt(ch)
    p = jax.nn.softmax(s, axis=-1)
    o = jnp.einsum("bqk,bck->bcq", p, v)
    return o.reshape(bs, n_heads * ch, length).astype(qkv.dtype)


def _attention_block_ref(x, cond, params, num_heads=1):
    b, c = x.shape[0], x.shape[1]
    xf = x.reshape(b, c, -1)
    cf = cond.reshape(b, c, -1)
    kv = conv1x1(cf, params["to_kv_w"], params["to_kv_b"])
    q = conv1x1(group_norm(xf, params["norm_w"], params["norm_b"]),
                params["to_q_w"], params["to_q_b"])
    qkv = jnp.concatenate([q, kv], axis=1)
    h = _qkv_attention_ref(qkv, num_heads)
    h = conv1x1(h, params["proj_w"], params["proj_b"])
    return (xf + h).reshape(x.shape)


# ----------------------------------------------------------------------------
if __name__ == "__main__":
    key = jax.random.PRNGKey(0)
    k0, k1, k2, k3, k4, k5, k6 = jax.random.split(key, 7)

    # --- 1) standalone QKVAttention kernel check (multi-head -> exercises
    #        the head-batched (H_TILE, C, L) path) ---
    bs, n_heads, ch, length = 4, 2, 16, 32
    qkv = jax.random.normal(k0, (bs, 3 * n_heads * ch, length), jnp.float32)
    out = jax.block_until_ready(qkv_attention(qkv, n_heads))
    ref = _qkv_attention_ref(qkv, n_heads)
    assert out.shape == (bs, n_heads * ch, length), out.shape
    assert jnp.allclose(out, ref, atol=1e-4, rtol=1e-4), \
        float(jnp.max(jnp.abs(out - ref)))

    # --- 2) full AttentionBlock forward ---
    b, c, spatial = 2, 32, (4, 4)        # GroupNorm(32, c) needs c % 32 == 0
    x = jax.random.normal(k1, (b, c) + spatial, jnp.float32)
    cond = jax.random.normal(k2, (b, c) + spatial, jnp.float32)
    params = {
        "norm_w": jnp.ones((c,), jnp.float32),
        "norm_b": jnp.zeros((c,), jnp.float32),
        "to_q_w": 0.2 * jax.random.normal(k3, (c, c), jnp.float32),
        "to_q_b": jnp.zeros((c,), jnp.float32),
        "to_kv_w": 0.2 * jax.random.normal(k4, (2 * c, c), jnp.float32),
        "to_kv_b": jnp.zeros((2 * c,), jnp.float32),
        # proj_out2 is zero-initialized (zero_module) in the PyTorch module;
        # use small random weights here so this check exercises the full graph
        # (the init-faithful zero case is checked separately below).
        "proj_w": 0.2 * jax.random.normal(k5, (c, c), jnp.float32),
        "proj_b": 0.02 * jax.random.normal(k6, (c,), jnp.float32),
    }
    out_blk = jax.block_until_ready(attention_block_forward(x, cond, params))
    ref_blk = _attention_block_ref(x, cond, params)
    assert out_blk.shape == x.shape, out_blk.shape
    assert jnp.allclose(out_blk, ref_blk, atol=1e-4, rtol=1e-4), \
        float(jnp.max(jnp.abs(out_blk - ref_blk)))

    # --- 3) init-faithful check: zero proj_out2  =>  output == x ---
    params_zero = dict(params,
                       proj_w=jnp.zeros((c, c), jnp.float32),
                       proj_b=jnp.zeros((c,), jnp.float32))
    out_zero = jax.block_until_ready(
        attention_block_forward(x, cond, params_zero))
    assert jnp.allclose(out_zero, x, atol=1e-6, rtol=0)

    print("KERNEL_OK")
</pallas_src>

<mosaic_0001>
module attributes {stable_mosaic.version = 11 : i64} {
  func.func @_attn_kernel(%arg0: i32, %arg1: memref<4x16x32xf32, #tpu.memory_space<vmem>>, %arg2: memref<4x16x32xf32, #tpu.memory_space<vmem>>, %arg3: memref<4x16x32xf32, #tpu.memory_space<vmem>>, %arg4: memref<4x16x32xf32, #tpu.memory_space<vmem>>) attributes {dimension_semantics = [#tpu.dimension_semantics<parallel>], iteration_bounds = array<i64: 2>, scalar_prefetch = 0 : i64, scratch_operands = 0 : i64, tpu.core_type = #tpu.core_type<tc>, window_params = [{transform_indices = @transform_0, window_bounds = array<i64: 4, 16, 32>}, {transform_indices = @transform_1, window_bounds = array<i64: 4, 16, 32>}, {transform_indices = @transform_2, window_bounds = array<i64: 4, 16, 32>}, {transform_indices = @transform_3, window_bounds = array<i64: 4, 16, 32>}]} {
    %c0 = arith.constant 0 : index
    %c0_0 = arith.constant 0 : index
    %c0_1 = arith.constant 0 : index
    %0 = vector.load %arg1[%c0, %c0_0, %c0_1] : memref<4x16x32xf32, #tpu.memory_space<vmem>>, vector<4x16x32xf32>
    %cst = arith.constant 2.500000e-01 : f32
    %1 = vector.broadcast %cst : f32 to vector<4x16x32xf32>
    %2 = arith.mulf %0, %1 : vector<4x16x32xf32>
    %c0_2 = arith.constant 0 : index
    %c0_3 = arith.constant 0 : index
    %c0_4 = arith.constant 0 : index
    %3 = vector.load %arg2[%c0_2, %c0_3, %c0_4] : memref<4x16x32xf32, #tpu.memory_space<vmem>>, vector<4x16x32xf32>
    %c0_5 = arith.constant 0 : index
    %c0_6 = arith.constant 0 : index
    %c0_7 = arith.constant 0 : index
    %4 = vector.load %arg3[%c0_5, %c0_6, %c0_7] : memref<4x16x32xf32, #tpu.memory_space<vmem>>, vector<4x16x32xf32>
    %cst_8 = arith.constant dense<0.000000e+00> : vector<4x32x32xf32>
    %5 = tpu.matmul %2, %3, %cst_8 {dimension_numbers = #tpu.dot_dimension_numbers<[1], [1], [2], [2], [0, 0, 0, 2, 1, 2], [0], [0]>} : vector<4x16x32xf32>, vector<4x16x32xf32>, vector<4x32x32xf32> -> vector<4x32x32xf32>
    %cst_9 = arith.constant dense<0xFF800000> : vector<4x32xf32>
    %6 = vector.multi_reduction <maximumf>, %5, %cst_9 [2] : vector<4x32x32xf32> to vector<4x32xf32>
    %7 = vector.shape_cast %6 : vector<4x32xf32> to vector<4x32x1xf32>
    %8 = vector.broadcast %7 : vector<4x32x1xf32> to vector<4x32x32xf32>
    %9 = arith.subf %5, %8 : vector<4x32x32xf32>
    %10 = math.exp %9 : vector<4x32x32xf32>
    %cst_10 = arith.constant dense<0.000000e+00> : vector<4x32xf32>
    %11 = vector.multi_reduction <add>, %10, %cst_10 [2] : vector<4x32x32xf32> to vector<4x32xf32>
    %cst_11 = arith.constant dense<0.000000e+00> : vector<4x16x32xf32>
    %12 = tpu.matmul %4, %10, %cst_11 {dimension_numbers = #tpu.dot_dimension_numbers<[2], [2], [1], [1], [0, 0, 0, 1, 1, 1], [0], [0]>} : vector<4x16x32xf32>, vector<4x32x32xf32>, vector<4x16x32xf32> -> vector<4x16x32xf32>
    %13 = tpu.reciprocal %11 : vector<4x32xf32> -> vector<4x32xf32>
    %14 = vector.shape_cast %13 : vector<4x32xf32> to vector<4x1x32xf32>
    %15 = vector.broadcast %14 : vector<4x1x32xf32> to vector<4x16x32xf32>
    %16 = arith.mulf %12, %15 : vector<4x16x32xf32>
    %c0_12 = arith.constant 0 : index
    %c0_13 = arith.constant 0 : index
    %c0_14 = arith.constant 0 : index
    %17 = vector.load %arg4[%c0_12, %c0_13, %c0_14] : memref<4x16x32xf32, #tpu.memory_space<vmem>>, vector<4x16x32xf32>
    tpu.vector_store %arg4[%c0_12, %c0_13, %c0_14], %16 {strides = array<i32>} : memref<4x16x32xf32, #tpu.memory_space<vmem>>, vector<4x16x32xf32>,
    return
  }
  func.func @transform_0(%arg0: i32) -> (i32, i32, i32) {
    %c0_i32 = arith.constant 0 : i32
    %c0_i32_0 = arith.constant 0 : i32
    %c0_i32_1 = arith.constant 0 : i32
    return %arg0, %c0_i32, %c0_i32_0 : i32, i32, i32
  }
  func.func @transform_1(%arg0: i32) -> (i32, i32, i32) {
    %c0_i32 = arith.constant 0 : i32
    %c0_i32_0 = arith.constant 0 : i32
    %c0_i32_1 = arith.constant 0 : i32
    return %arg0, %c0_i32, %c0_i32_0 : i32, i32, i32
  }
  func.func @transform_2(%arg0: i32) -> (i32, i32, i32) {
    %c0_i32 = arith.constant 0 : i32
    %c0_i32_0 = arith.constant 0 : i32
    %c0_i32_1 = arith.constant 0 : i32
    return %arg0, %c0_i32, %c0_i32_0 : i32, i32, i32
  }
  func.func @transform_3(%arg0: i32) -> (i32, i32, i32) {
    %c0_i32 = arith.constant 0 : i32
    %c0_i32_0 = arith.constant 0 : i32
    %c0_i32_1 = arith.constant 0 : i32
    return %arg0, %c0_i32, %c0_i32_0 : i32, i32, i32
  }
}

</mosaic_0001>

<bundles_post_ra>
// kernel: tpu_custom_call.1
= control target key start
LH: loop header
LB: loop body
LE: loop exit
PB: predicated region body
PF: predicated region fallthrough
CT: control target
= control target key end

     0   :  { %s2709_s0 = inlined_call_operand.hbm [shape: f32[8,16,32], index: 0, kind: input, shape index: {}]   ;;  %s2710_s1 = inlined_call_operand.hbm [shape: f32[8,16,32], index: 1, kind: input, shape index: {}]   ;;  %s2711_s2 = inlined_call_operand.hbm [shape: f32[8,16,32], index: 2, kind: input, shape index: {}]   ;;  %s2712_s3 = inlined_call_operand.hbm [shape: f32[8,16,32], index: 3, kind: output, shape index: {}]  }
   0x1   :  { %2719 = sst [smem:[#allocation12_spill]] %s2709_s0 }
   0x2   :  { %8 = vsyncpa [#allocation3], 0 }
   0x3   :  { %10 = vsyncpa [#allocation3 + $0x1], 0 }
   0x4   :  { %11 = vsyncpa [#allocation6], 0 }
   0x5   :  { %13 = vsyncpa [#allocation6 + $0x1], 0 }
   0x6   :  { %14 = vsyncpa [#allocation4], 0 }
   0x7   :  { %16 = vsyncpa [#allocation4 + $0x1], 0  ;;  %s2221_s12 = smov 0   ;;  %s2223_s13 = smov 0  }
   0x8   :  { %s2225_s14 = smov 0   ;;  %s2227_s15 = smov 0  }
   0x9 LB: > { %s2242_s16 = sadd.s32 4294967295, %s2191_s15   ;;  %s1636_s17 = sadd.s32 4294967294, %s2191_s15   ;;  %s2191_s15 = sphi %s2227_s15, %s2740_s15   ;;  %s2187_s14 = sphi %s2225_s14, %s2739_s14   ;;  %s2183_s13 = sphi %s2223_s13, %s2738_s13   ;;  %s2179_s12 = sphi %s2221_s12, %s2737_s12  }
   0xa   : > { %s2246_s18 = sadd.s32 1, %s2191_s15   ;;  %s29_s19 = sadd.s32 1, %s2187_s14 }
   0xb   : > { %s26_s20 = ssub.s32 %s2191_s15, %s2246_s18  ;;  %p36_p0 = scmp.ne.s32.totalorder %s2187_s14, %s2183_s13 }
   0xc   : > { %p27_p1 = scmp.eq.s32.totalorder %s26_s20, 0  ;;  %p37_p2 = scmp.eq.s32.totalorder %s2191_s15, 0 }
   0xd   : > { %p42_p3 = scmp.ne.s32.totalorder %s2183_s13, %s2179_s12  ;;  %p43_p4 = scmp.eq.s32.totalorder %s2242_s16, 0 }
   0xe   : > { %s2258_s21 = scalar_select %p27_p1, %s2187_s14, %s29_s19  }
   0xf   : > { %p38_p5 = por %p37_p2, %p36_p0  ;;  %p2260_p6 = por %p43_p4, %p42_p3 }
  0x10   : > { %p118_p7 = scmp.eq.s32.totalorder %s2242_s16, 1  ;;  %p124_p8 = scmp.eq.s32.totalorder %s1636_s17, 1 }
  0x11   : > { %s2720_s22 = scalar_select %p2260_p6, 1, 0 }
  0x12   : > { %p1928_p10 = scmp.lt.s32.totalorder %s2191_s15, 2  ;;  %p2267_p11 = por %p118_p7, %p36_p0 }
  0x13   : > { %p2271_p12 = por %p124_p8, %p42_p3  ;;  %s144_s25 = sand.u32 1, %s2187_s14  }
  0x14   : > { %s2721_s23 = scalar_select %p2267_p11, 1, 0 }
  0x15   : > { %s2722_s24 = scalar_select %p2271_p12, 1, 0 }
  0x16   : > { %s2277_s26 = sshll.u32 %s2191_s15, 10  ;;  %s2281_s27 = sshll.u32 %s144_s25, 6 }
  0x17   : > { %p2283_p13 = pnand %p1928_p10, %p38_p5  ;;  %s166_s29 = sand.u32 1, %s2191_s15  }
  0x18   : > { %s2292_s5 = scalar_lea.hbm %s2710_s1, %s2277_s26  ;;  %s170_s6 = scalar_lea.vmem [#allocation5], %s2281_s27 }
  0x19   : > { %s178_s7 = sshll.u32 %s170_s6, 4  ;;  %s2298_s8 = scalar_lea.sflag [#allocation6], %s166_s29  ;;  %s2295_s7 = int_to_ptr.vmem [resolvable:$true] %s178_s7 }
  0x1a   : > { %s2031_s9 = scalar_lea.hbm %s2292_s5, 1024  ;;  %p2304_p2 = pneg %p2283_p13 }
  0x1b   : > { %p2032_p1 = scmp.ne.s32.totalorder %s2292_s5, %s2031_s9  ;;  %s2036_s19 = scalar_lea.hbm %s2710_s1, 2048 }
  0x1c   : > { %p2037_p5 = scmp.lt.u32.totalorder %s2292_s5, %s2710_s1  ;;  %p2038_p7 = scmp.lt.u32.totalorder %s2036_s19, %s2031_s9 }
  0x1d   : > { %p2034_p3 = pnand %p2304_p2, %p2032_p1  ;;  %p2040_p10 = scmp.lt.u32.totalorder %s2031_s9, %s2292_s5 }
  0x1e   : > { %p2039_p8 = por %p2038_p7, %p2037_p5 }
  0x1f   : > { %p2035_p4 = pneg %p2034_p3 }
  0x20   : > { %p2041_p9 = por %p2040_p10, %p2039_p8 }
  0x22   : > { %p2042_p0 = pnand %p2041_p9, %p2035_p4 }
  0x24   : > { %2045 = shalt.err (!%p2042_p0)
}
  0x25   : > { %s2046_s29 = scalar_lea.vmem %s2295_s7, 1024  ;;  %s2193_s4 = smov [#allocation5]  }
  0x26   : > { %p2047_p1 = scmp.ne.s32.totalorder %s2295_s7, %s2046_s29  ;;  %s2051_s6 = sshll.u32 %s2193_s4, 4  ;;  %s2052_s6 = int_to_ptr.vmem [resolvable:$false] %s2051_s6 }
  0x27   : > { %s2053_s11 = scalar_lea.vmem %s2052_s6, 2048  ;;  %p2054_p11 = scmp.lt.s32.totalorder %s2295_s7, %s2052_s6 }
  0x28   : > { %p2049_p3 = pnand %p2047_p1, %p2304_p2  ;;  %p2055_p6 = scmp.lt.s32.totalorder %s2053_s11, %s2046_s29 }
  0x2a   : > { %p2050_p12 = pneg %p2049_p3  ;;  %p2056_p5 = por %p2055_p6, %p2054_p11 }
  0x2c   : > { %p2057_p7 = pnand %p2056_p5, %p2050_p12 }
  0x2e   : > { %2060 = shalt.err (!%p2057_p7)
}
  0x2f   : > { %s2715_s9 = smov 128   ;;  %s2717_s17 = smov 8  }
  0x30   : > { %1920 = dma.hbm_to_vmem [thread:$0]  (!%p2283_p13), %s2292_s5, 1024, %s2295_s7, %s2298_s8, %s2715_s9, %s2715_s9, %s2717_s17  }
  0x31   : > { %p208_p6 = scmp.lt.s32.totalorder %s2191_s15, 3  ;;  %s2725_s0 = sld [smem:[#allocation12_spill]] }
  0x32   : > { %p2726_p9 = scmp.ge.s32.totalorder %s2191_s15, 1  ;;  %s148_s4 = scalar_lea.vmem [#allocation2], %s2281_s27 }
  0x33   : > { %s156_s6 = sshll.u32 %s148_s4, 4  ;;  %s2349_s5 = scalar_lea.sflag [#allocation3], %s144_s25  ;;  %s2345_s6 = int_to_ptr.vmem [resolvable:$true] %s156_s6 }
  0x34   : > { %p2340_p11 = pnand %p2726_p9, %p208_p6 }
  0x36   : > { %s2727_s29 = scalar_select %p2340_p11, 1, 0 }
  0x37   : > { %s2336_s30 = scalar_lea.hbm %s2725_s0, %s2277_s26  ;;  %s2066_s20 = scalar_lea.hbm %s2725_s0, 2048 }
  0x38   : > { %s2061_s7 = scalar_lea.hbm %s2336_s30, 1024  ;;  %p2067_p8 = scmp.lt.u32.totalorder %s2336_s30, %s2725_s0 }
  0x39   : > { %p2062_p12 = scmp.ne.s32.totalorder %s2336_s30, %s2061_s7  ;;  %p2068_p10 = scmp.lt.u32.totalorder %s2066_s20, %s2061_s7 }
  0x3a   : > { %p2070_p3 = scmp.lt.u32.totalorder %s2061_s7, %s2336_s30 }
  0x3b   : > { %p2064_p0 = pnand %p2062_p12, %p2304_p2  ;;  %p2069_p1 = por %p2068_p10, %p2067_p8 }
  0x3d   : > { %p2065_p4 = pneg %p2064_p0  ;;  %p2071_p5 = por %p2070_p3, %p2069_p1 }
  0x3f   : > { %p2072_p7 = pnand %p2071_p5, %p2065_p4 }
  0x41   : > { %2075 = shalt.err (!%p2072_p7)
}
  0x42   : > { %s2076_s25 = scalar_lea.vmem %s2345_s6, 1024  ;;  %s2196_s4 = smov [#allocation2]  }
  0x43   : > { %p2077_p6 = scmp.ne.s32.totalorder %s2345_s6, %s2076_s25  ;;  %s2081_s11 = sshll.u32 %s2196_s4, 4  ;;  %s2082_s11 = int_to_ptr.vmem [resolvable:$false] %s2081_s11 }
  0x44   : > { %s2083_s9 = scalar_lea.vmem %s2082_s11, 2048  ;;  %p2084_p0 = scmp.lt.s32.totalorder %s2345_s6, %s2082_s11 }
  0x45   : > { %p2079_p9 = pnand %p2077_p6, %p2304_p2  ;;  %p2085_p11 = scmp.lt.s32.totalorder %s2083_s9, %s2076_s25 }
  0x47   : > { %p2080_p12 = pneg %p2079_p9  ;;  %p2086_p8 = por %p2085_p11, %p2084_p0 }
  0x49   : > { %p2087_p10 = pnand %p2086_p8, %p2080_p12 }
  0x4b   : > { %2090 = shalt.err (!%p2087_p10)
}
  0x4c   : > { %s2728_s17 = smov 8   ;;  %s2729_s7 = smov 128  }
  0x4d   : > { %1917 = dma.hbm_to_vmem [thread:$0]  (!%p2283_p13), %s2336_s30, 1024, %s2345_s6, %s2349_s5, %s2729_s7, %s2729_s7, %s2728_s17  }
  0x4e   : > { %s2380_s4 = scalar_lea.hbm %s2711_s2, %s2277_s26  ;;  %s192_s25 = scalar_lea.vmem [#allocation7], %s2281_s27 }
  0x4f   : > { %s200_s11 = sshll.u32 %s192_s25, 4  ;;  %s2091_s9 = scalar_lea.hbm %s2380_s4, 1024  ;;  %s2383_s11 = int_to_ptr.vmem [resolvable:$true] %s200_s11 }
  0x50   : > { %p2092_p11 = scmp.ne.s32.totalorder %s2380_s4, %s2091_s9  ;;  %s2096_s6 = scalar_lea.hbm %s2711_s2, 2048 }
  0x51   : > { %p2097_p3 = scmp.lt.u32.totalorder %s2380_s4, %s2711_s2  ;;  %p2098_p5 = scmp.lt.u32.totalorder %s2096_s6, %s2091_s9 }
  0x52   : > { %p2094_p4 = pnand %p2092_p11, %p2304_p2  ;;  %p2100_p6 = scmp.lt.u32.totalorder %s2091_s9, %s2380_s4 }
  0x53   : > { %p2099_p7 = por %p2098_p5, %p2097_p3 }
  0x54   : > { %p2095_p1 = pneg %p2094_p4 }
  0x55   : > { %p2101_p9 = por %p2100_p6, %p2099_p7 }
  0x57   : > { %p2102_p12 = pnand %p2101_p9, %p2095_p1 }
  0x59   : > { %2105 = shalt.err (!%p2102_p12)
}
  0x5a   : > { %s2106_s27 = scalar_lea.vmem %s2383_s11, 1024  ;;  %s2197_s0 = smov [#allocation7]  }
  0x5b   : > { %p2107_p0 = scmp.ne.s32.totalorder %s2383_s11, %s2106_s27  ;;  %s2111_s19 = sshll.u32 %s2197_s0, 4  ;;  %s2112_s19 = int_to_ptr.vmem [resolvable:$false] %s2111_s19 }
  0x5c   : > { %s2113_s20 = scalar_lea.vmem %s2112_s19, 2048  ;;  %p2114_p11 = scmp.lt.s32.totalorder %s2383_s11, %s2112_s19 }
  0x5d   : > { %p2109_p8 = pnand %p2107_p0, %p2304_p2  ;;  %p2115_p4 = scmp.lt.s32.totalorder %s2113_s20, %s2106_s27 }
  0x5f   : > { %p2110_p10 = pneg %p2109_p8  ;;  %p2116_p3 = por %p2115_p4, %p2114_p11 }
  0x61   : > { %p2117_p5 = pnand %p2116_p3, %p2110_p10 }
  0x63   : > { %2120 = shalt.err (!%p2117_p5)
}
  0x64   : > { %1923 = dma.hbm_to_vmem [thread:$0]  (!%p2283_p13), %s2380_s4, 1024, %s2383_s11, %s2298_s8, %s2729_s7, %s2729_s7, %s2728_s17  }
  0x65   : > { %p2730_p2 = scmp.ne.s32.totalorder %s2727_s29, 0 }
  0x66   : > { %s2413_s10 = sand.u32 (!%p2730_p2), 1, %s2183_s13   ;;  %p2731_p1 = scmp.ne.s32.totalorder (!%p2730_p2), %s2720_s22, 0 }
  0x67   : > { %212 = sbr.rel (%p2730_p2) target bundleno = 892 (0x37c), region = 32  ;;  %s2416_s25 = sshll.u32 (!%p2730_p2), %s2413_s10, 6 }
  0x68   : > { %s215_s28 = scalar_lea.sflag (!%p2730_p2), [#allocation3], %s2413_s10  ;;  %s2420_s9 = scalar_lea.vmem (!%p2730_p2), [#allocation2], %s2416_s25 }
  0x6e   : > { %2166 = dma.done.wait (%p2731_p1), %s215_s28, 1024  }
  0x6f   : > { %2168 = vsyncadd (%p2731_p1), %s215_s28, 4294966272  ;;  %s223_s8 = sand.u32 1, %s2242_s16   ;;  %s2428_s17 = scalar_lea.vmem [#allocation5], %s2416_s25 }
  0x70   : > { %s224_s29 = scalar_lea.sflag [#allocation6], %s223_s8 }
  0x71   : > { %2170 = dma.done.wait (%p2731_p1), %s224_s29, 2048  }
  0x72   : > { %2172 = vsyncadd (%p2731_p1), %s224_s29, 4294965248  ;;  %v273_v0 = vld [vmem:[%s2420_s9] sm:$0xff]  ;;  %v275_v1 = vld [vmem:[%s2420_s9 + $0x10] sm:$0xff]  ;;  %vm337_vm0 = vcmask 130048   ;;  %vm822_vm1 = vcmask 261120   ;;  %s2519_s22 = scalar_lea.vmem [#allocation7], %s2416_s25 }
  0x73   : > { %v274_v2 = vld [vmem:[%s2420_s9 + $0x8] sm:$0xff]  ;;  %v281_v3 = vmul.f32 0.25, %v273_v0  ;;  %v283_v4 = vmul.f32 0.25, %v275_v1  ;;  %v276_v5 = vld [vmem:[%s2420_s9 + $0x18] sm:$0xff]  ;;  %v289_v6 = vld [vmem:[%s2428_s17] sm:$0xff]  ;;  %vm1382_vm3 = vcmask 130112  }
  0x74   : > { %v282_v7 = vmul.f32 0.25, %v274_v2  ;;  %v284_v8 = vmul.f32 0.25, %v276_v5  ;;  %v290_v9 = vld [vmem:[%s2428_s17 + $0x8] sm:$0xff]  ;;  %v291_v11 = vld [vmem:[%s2428_s17 + $0x10] sm:$0xff]  ;;  %v292_v12 = vld [vmem:[%s2428_s17 + $0x18] sm:$0xff]  ;;  %vm1389_vm4 = vcmask 195712  }
  0x75   : > { %305 = vxpose.xlu0.b32.start [1/2] (short) (narrow) %v281_v3, 32  ;;  %435 = vxpose.xlu1.b32.start [1/2] (short) (narrow) %v283_v4, 32  ;;  %v1842_v10 = vpack.c.bf16 %v290_v9, %v289_v6  ;;  %v1846_v13 = vpack.c.bf16 %v292_v12, %v291_v11  ;;  %v277_v14 = vld [vmem:[%s2420_s9 + $0x20] sm:$0xff]  ;;  %v279_v15 = vld [vmem:[%s2420_s9 + $0x30] sm:$0xff]  ;;  %v278_v18 = vld [vmem:[%s2420_s9 + $0x28] sm:$0xff]  ;;  %vm1396_vm5 = vcmask 261312  }
  0x76   : > { %v285_v16 = vmul.f32 0.25, %v277_v14  ;;  %v287_v17 = vmul.f32 0.25, %v279_v15  ;;  %v280_v19 = vld [vmem:[%s2420_s9 + $0x38] sm:$0xff]  ;;  %v286_v20 = vmul.f32 0.25, %v278_v18  ;;  %v293_v22 = vld [vmem:[%s2428_s17 + $0x20] sm:$0xff]  ;;  %v294_v23 = vld [vmem:[%s2428_s17 + $0x28] sm:$0xff] }
  0x77   : > { %1843 = vmatprep.subr.bf16.mxu0 %v1842_v10  ;;  %1847 = vmatprep.subr.bf16.mxu1 %v1846_v13  ;;  %v288_v21 = vmul.f32 0.25, %v280_v19  ;;  %v1850_v24 = vpack.c.bf16 %v294_v23, %v293_v22  ;;  %v295_v25 = vld [vmem:[%s2428_s17 + $0x30] sm:$0xff]  ;;  %v296_v26 = vld [vmem:[%s2428_s17 + $0x38] sm:$0xff]  ;;  %v297_v12 = vld [vmem:[%s2519_s22] sm:$0xff]  ;;  %s2625_s7 = scalar_lea.vmem [#allocation8], %s2416_s25  ;;  %s1709_s4 = sshll.u32 %s2242_s16, 10 }
  0x78   : > { %1845 = vmatpush3.bf16.msra.mxu0 %v1842_v10  ;;  %1849 = vmatpush3.bf16.msra.mxu1 %v1846_v13  ;;  %v1854_v27 = vpack.c.bf16 %v296_v26, %v295_v25  ;;  %v299_v13 = vld [vmem:[%s2519_s22 + $0x10] sm:$0xff]  ;;  %vm2531_vm2 = vmpackc.low %vm822_vm1, %vm822_vm1  ;;  %s1520_s11 = sshll.u32 %s2625_s7, 4  ;;  %s2659_s5 = scalar_lea.hbm %s2712_s3, %s1709_s4  ;;  %s2661_s11 = int_to_ptr.vmem [resolvable:$true] %s1520_s11 }
  0x79   : > { %306 = vxpose.xlu0.b32.end [2/2] (short) (narrow) %v282_v7, 32  ;;  %436 = vxpose.xlu1.b32.end [2/2] (short) (narrow) %v284_v8, 32  ;;  %s1506_s16 = scalar_lea.sflag [#allocation4], %s2413_s10  ;;  %s2121_s26 = scalar_lea.vmem %s2661_s11, 1024 }
  0x7a   : > { %1851 = vmatprep.subr.bf16.mxu0 %v1850_v24  ;;  %1855 = vmatprep.subr.bf16.mxu1 %v1854_v27  ;;  %p2122_p13 = scmp.ne.s32.totalorder %s2661_s11, %s2121_s26  ;;  %p2734_p7 = scmp.ne.s32.totalorder %s2721_s23, 0 }
  0x7b   : > { %s2198_s27 = smov [#allocation8]  }
  0x7c   : > { %p2123_p6 = pnand %p2122_p13, %p2734_p7  ;;  %s2125_s0 = sshll.u32 %s2198_s27, 4  ;;  %s2126_s0 = int_to_ptr.vmem [resolvable:$false] %s2125_s0 }
  0x7d   : > { %s2127_s19 = scalar_lea.vmem %s2126_s0, 2048  ;;  %p2128_p12 = scmp.lt.s32.totalorder %s2661_s11, %s2126_s0 }
  0x7e   : > { %p2124_p9 = pneg %p2123_p6  ;;  %p2129_p0 = scmp.lt.s32.totalorder %s2127_s19, %s2121_s26 }
  0x80   : > { %p2130_p8 = por %p2129_p0, %p2128_p12 }
  0x82   : > { %564 = vxpose.xlu0.b32.start [1/2] (short) (narrow) %v285_v16, 32  ;;  %693 = vxpose.xlu1.b32.start [1/2] (short) (narrow) %v287_v17, 32  ;;  %p2131_p10 = pnand %p2130_p8, %p2124_p9 }
  0x86   : > { %565 = vxpose.xlu0.b32.end [2/2] (short) (narrow) %v286_v20, 32  ;;  %694 = vxpose.xlu1.b32.end [2/2] (short) (narrow) %v288_v21, 32 }
  0xf5   : > { %v321_v28 = vpop.trf.xlu0  ;;  %v451_v29 = vpop.trf.xlu1 }
  0xf6   : > { %1762 = vmatprep.mubr.msk.f32.mxu0 %vm337_vm0, %v321_v28  ;;  %1772 = vmatprep.mubr.msk.f32.mxu1 %vm337_vm0, %v451_v29 }
  0xf9   : > { %v322_v30 = vpop.trf.xlu0  ;;  %v452_v31 = vpop.trf.xlu1 }
  0xfa   : > { %1763 = vmatmul.mubr.msk.f32.vlgmr.msra.gmra.mrb[0].mxu0 %vm337_vm0, %v322_v30  ;;  %1773 = vmatmul.mubr.msk.f32.vlgmr.msra.gmra.mrb[0].mxu1 %vm337_vm0, %v452_v31 }
  0xfb   : > { %1853 = vmatpush3.bf16.msra.mxu0 %v1850_v24  ;;  %1857 = vmatpush3.bf16.msra.mxu1 %v1854_v27 }
  0xfd   : > { %v323_v32 = vpop.trf.xlu0  ;;  %v453_v33 = vpop.trf.xlu1 }
  0xfe   : > { %1765 = vmatprep.mubr.msk.f32.mxu0 %vm337_vm0, %v323_v32  ;;  %1775 = vmatprep.mubr.msk.f32.mxu1 %vm337_vm0, %v453_v33 }
 0x101   : > { %v324_v34 = vpop.trf.xlu0  ;;  %v454_v35 = vpop.trf.xlu1 }
 0x102   : > { %1766 = vmatmul.mubr.msk.f32.gmra.mrb[2].mxu0 %vm337_vm0, %v324_v34  ;;  %1776 = vmatmul.mubr.msk.f32.gmra.mrb[2].mxu1 %vm337_vm0, %v454_v35 }
 0x105   : > { %v580_v36 = vpop.trf.xlu0  ;;  %v709_v37 = vpop.trf.xlu1 }
 0x106   : > { %1782 = vmatprep.mubr.msk.f32.mxu0 %vm337_vm0, %v580_v36  ;;  %1792 = vmatprep.mubr.msk.f32.mxu1 %vm337_vm0, %v709_v37 }
 0x109   : > { %v581_v38 = vpop.trf.xlu0  ;;  %v710_v39 = vpop.trf.xlu1 }
 0x10a   : > { %1783 = vmatmul.mubr.msk.f32.vlgmr.msra.gmra.mrb[4].mxu0 %vm337_vm0, %v581_v38  ;;  %1793 = vmatmul.mubr.msk.f32.vlgmr.msra.gmra.mrb[4].mxu1 %vm337_vm0, %v710_v39 }
 0x10d   : > { %v582_v40 = vpop.trf.xlu0  ;;  %v711_v41 = vpop.trf.xlu1 }
 0x10e   : > { %1785 = vmatprep.mubr.msk.f32.mxu0 %vm337_vm0, %v582_v40  ;;  %1795 = vmatprep.mubr.msk.f32.mxu1 %vm337_vm0, %v711_v41 }
 0x111   : > { %v583_v42 = vpop.trf.xlu0  ;;  %v712_v43 = vpop.trf.xlu1 }
 0x112   : > { %1786 = vmatmul.mubr.msk.f32.gmra.mrb[6].mxu0 %vm337_vm0, %v583_v42  ;;  %1796 = vmatmul.mubr.msk.f32.gmra.mrb[6].mxu1 %vm337_vm0, %v712_v43 }
 0x113   : > { %1806 = vmatprep.mubr.msk.f32.mxu0 %vm822_vm1, %v297_v12  ;;  %1817 = vmatprep.mubr.msk.f32.mxu1 %vm822_vm1, %v299_v13 }
 0x1cd   : > { %v1764_v44 = vpop.f32.mrb[0].mxu0  ;;  %v1774_v45 = vpop.f32.mrb[0].mxu1 }
 0x1ce   : > { %v416_v46 = vpop.f32.mrb[1].mxu0  ;;  %v826_v47 = vsel %vm822_vm1, %v1764_v44, -inf  ;;  %v2467_v48 = vpop.f32.mrb[1].mxu1  ;;  %v838_v50 = vsel %vm822_vm1, %v1774_v45, -inf }
 0x1cf   : > { %827 = vmax.xlane.f32.xlu1 %v826_v47  ;;  %v823_v49 = vsel %vm822_vm1, %v416_v46, -inf  ;;  %v835_v54 = vsel %vm822_vm1, %v2467_v48, -inf }
 0x1d0   : > { %824 = vmax.xlane.f32.xlu0 %v823_v49 }
 0x1d3   : > { %839 = vmax.xlane.f32.xlu1 %v838_v50 }
 0x1d5   : > { %v2471_v51 = vpop.f32.mrb[2].mxu0  ;;  %v2473_v52 = vpop.f32.mrb[2].mxu1 }
 0x1d6   : > { %v426_v53 = vpop.f32.mrb[3].mxu0  ;;  %v2477_v55 = vpop.f32.mrb[3].mxu1  ;;  %v832_v57 = vsel %vm822_vm1, %v2471_v51, -inf  ;;  %v844_v59 = vsel %vm822_vm1, %v2473_v52, -inf }
 0x1d7   : > { %836 = vmax.xlane.f32.xlu1 %v835_v54  ;;  %v829_v56 = vsel %vm822_vm1, %v426_v53, -inf  ;;  %v841_v58 = vsel %vm822_vm1, %v2477_v55, -inf }
 0x1d8   : > { %830 = vmax.xlane.f32.xlu0 %v829_v56 }
 0x1db   : > { %833 = vmax.xlane.f32.xlu1 %v832_v57 }
 0x1dc   : > { %842 = vmax.xlane.f32.xlu0 %v841_v58 }
 0x1dd   : > { %v2486_v60 = vpop.f32.mrb[4].mxu0  ;;  %v2488_v61 = vpop.f32.mrb[4].mxu1 }
 0x1de   : > { %v2490_v62 = vpop.f32.mrb[5].mxu0  ;;  %v2492_v63 = vpop.f32.mrb[5].mxu1  ;;  %v850_v1 = vsel %vm822_vm1, %v2486_v60, -inf  ;;  %v862_v3 = vsel %vm822_vm1, %v2488_v61, -inf }
 0x1df   : > { %845 = vmax.xlane.f32.xlu1 %v844_v59  ;;  %v847_v0 = vsel %vm822_vm1, %v2490_v62, -inf  ;;  %v859_v2 = vsel %vm822_vm1, %v2492_v63, -inf }
 0x1e0   : > { %848 = vmax.xlane.f32.xlu0 %v847_v0 }
 0x1e3   : > { %851 = vmax.xlane.f32.xlu1 %v850_v1 }
 0x1e4   : > { %860 = vmax.xlane.f32.xlu0 %v859_v2 }
 0x1e5   : > { %v2502_v4 = vpop.f32.mrb[6].mxu0  ;;  %v2504_v5 = vpop.f32.mrb[6].mxu1 }
 0x1e6   : > { %v2506_v6 = vpop.f32.mrb[7].mxu0  ;;  %v2508_v7 = vpop.f32.mrb[7].mxu1  ;;  %v856_v9 = vsel %vm822_vm1, %v2502_v4, -inf  ;;  %v868_v11 = vsel %vm822_vm1, %v2504_v5, -inf }
 0x1e7   : > { %863 = vmax.xlane.f32.xlu1 %v862_v3  ;;  %v853_v8 = vsel %vm822_vm1, %v2506_v6, -inf  ;;  %v865_v10 = vsel %vm822_vm1, %v2508_v7, -inf }
 0x1e8   : > { %854 = vmax.xlane.f32.xlu0 %v853_v8 }
 0x1eb   : > { %857 = vmax.xlane.f32.xlu1 %v856_v9 }
 0x1ec   : > { %866 = vmax.xlane.f32.xlu0 %v865_v10 }
 0x1ef   : > { %869 = vmax.xlane.f32.xlu1 %v868_v11 }
 0x25c   : > { %v828_v14 = vpop.xlane.xlu1 %827 }
 0x25d   : > { %v872_v15 = vsub.f32 %v1764_v44, %v828_v14  ;;  %v825_v16 = vpop.xlane.xlu0 %824 }
 0x25e   : > { %v871_v17 = vsub.f32 %v416_v46, %v825_v16 }
 0x25f   : > { %v889_v18 = vmul.f32 1.442695, %v872_v15 }
 0x260   : > { %v887_v19 = vmul.f32 1.442695, %v871_v17  ;;  %v840_v20 = vpop.xlane.xlu1 %839 }
 0x261   : > { %1967 = vpow2.f32 %v889_v18  ;;  %v876_v21 = vsub.f32 %v1774_v45, %v840_v20 }
 0x262   : > { %1969 = vpow2.f32 %v887_v19 }
 0x263   : > { %v897_v22 = vmul.f32 1.442695, %v876_v21  ;;  %v298_v21 = vld [vmem:[%s2519_s22 + $0x8] sm:$0xff] }
 0x264   : > { %v837_v23 = vpop.xlane.xlu1 %836 }
 0x265   : > { %1971 = vpow2.f32 %v897_v22  ;;  %v875_v24 = vsub.f32 %v2467_v48, %v837_v23  ;;  %v831_v25 = vpop.xlane.xlu0 %830 }
 0x266   : > { %v873_v26 = vsub.f32 %v426_v53, %v831_v25 }
 0x267   : > { %v895_v27 = vmul.f32 1.442695, %v875_v24 }
 0x268   : > { %v891_v28 = vmul.f32 1.442695, %v873_v26  ;;  %v834_v29 = vpop.xlane.xlu1 %833 }
 0x269   : > { %1973 = vpow2.f32 %v895_v27  ;;  %v874_v30 = vsub.f32 %v2471_v51, %v834_v29  ;;  %v843_v31 = vpop.xlane.xlu0 %842  ;;  %v300_v27 = vld [vmem:[%s2519_s22 + $0x18] sm:$0xff] }
 0x26a   : > { %v877_v32 = vsub.f32 %v2477_v55, %v843_v31  ;;  %1975 = vpow2.f32 %v891_v28  ;;  %v303_v31 = vld [vmem:[%s2519_s22 + $0x30] sm:$0xff] }
 0x26b   : > { %v1968_v33 = vpop.eup %1967  ;;  %v893_v34 = vmul.f32 1.442695, %v874_v30 }
 0x26c   : > { %v1970_v35 = vpop.eup %1969  ;;  %v899_v36 = vmul.f32 1.442695, %v877_v32  ;;  %v846_v37 = vpop.xlane.xlu1 %845  ;;  %v922_v38 = vsel %vm822_vm1, %v1968_v33, 0.0 }
 0x26d   : > { %1977 = vpow2.f32 %v893_v34  ;;  %v878_v40 = vsub.f32 %v2473_v52, %v846_v37  ;;  %923 = vadd.xlane.f32.xlu1 %v922_v38  ;;  %v849_v41 = vpop.xlane.xlu0 %848  ;;  %v919_v42 = vsel %vm822_vm1, %v1970_v35, 0.0  ;;  %v1858_v43 = vpack.c.bf16 %v1968_v33, %v1970_v35 }
 0x26e   : > { %v879_v44 = vsub.f32 %v2490_v62, %v849_v41  ;;  %920 = vadd.xlane.f32.xlu0 %v919_v42  ;;  %1979 = vpow2.f32 %v899_v36 }
 0x26f   : > { %v1972_v45 = vpop.eup %1971  ;;  %v901_v46 = vmul.f32 1.442695, %v878_v40  ;;  %1860 = vmatprep.subr.msk.bf16.mxu0 %vm2531_vm2, %v1858_v43 }
 0x270   : > { %v903_v47 = vmul.f32 1.442695, %v879_v44  ;;  %v852_v48 = vpop.xlane.xlu1 %851  ;;  %1863 = vmatpush3.bf16.xpose.msk.msra.mxu0 %vm2531_vm2, %v1858_v43  ;;  %v934_v49 = vsel %vm822_vm1, %v1972_v45, 0.0  ;;  %v302_v43 = vld [vmem:[%s2519_s22 + $0x28] sm:$0xff] }
 0x271   : > { %1981 = vpow2.f32 %v901_v46  ;;  %v880_v50 = vsub.f32 %v2486_v60, %v852_v48  ;;  %935 = vadd.xlane.f32.xlu1 %v934_v49  ;;  %v861_v51 = vpop.xlane.xlu0 %860 }
 0x272   : > { %v883_v52 = vsub.f32 %v2492_v63, %v861_v51  ;;  %1983 = vpow2.f32 %v903_v47 }
 0x273   : > { %v1974_v53 = vpop.eup %1973  ;;  %v905_v54 = vmul.f32 1.442695, %v880_v50 }
 0x274   : > { %v911_v55 = vmul.f32 1.442695, %v883_v52  ;;  %v864_v56 = vpop.xlane.xlu1 %863  ;;  %v931_v57 = vsel %vm822_vm1, %v1974_v53, 0.0  ;;  %v1870_v58 = vpack.c.bf16 %v1972_v45, %v1974_v53  ;;  %v1976_v0 = vpop.eup %1975  ;;  %v304_v45 = vld [vmem:[%s2519_s22 + $0x38] sm:$0xff] }
 0x275   : > { %1985 = vpow2.f32 %v905_v54  ;;  %v884_v59 = vsub.f32 %v2488_v61, %v864_v56  ;;  %932 = vadd.xlane.f32.xlu0 %v931_v57  ;;  %v855_v62 = vpop.xlane.xlu0 %854  ;;  %v1371_v54 = vlaneseq }
 0x276   : > { %v881_v60 = vsub.f32 %v2506_v6, %v855_v62  ;;  %1872 = vmatprep.subr.msk.bf16.mxu1 %vm2531_vm2, %v1870_v58  ;;  %1987 = vpow2.f32 %v911_v55 }
 0x277   : > { %v1978_v63 = vpop.eup %1977  ;;  %v913_v1 = vmul.f32 1.442695, %v884_v59  ;;  %1875 = vmatpush3.bf16.xpose.msk.msra.mxu1 %vm2531_vm2, %v1870_v58  ;;  %v1372_v55 = vand.u32 127, %v1371_v54  ;;  %v1374_v58 = vshrl.u32 %v1371_v54, 7 }
 0x278   : > { %v907_v2 = vmul.f32 1.442695, %v881_v60  ;;  %v858_v3 = vpop.xlane.xlu1 %857  ;;  %v928_v8 = vsel %vm822_vm1, %v1978_v63, 0.0  ;;  %v1864_v9 = vpack.c.bf16 %v1978_v63, %v1976_v0  ;;  %v1980_v6 = vpop.eup %1979 }
 0x279   : > { %1989 = vpow2.f32 %v913_v1  ;;  %v882_v61 = vsub.f32 %v2502_v4, %v858_v3  ;;  %929 = vadd.xlane.f32.xlu0 %v928_v8  ;;  %v867_v10 = vpop.xlane.xlu0 %866  ;;  %v925_v4 = vsel %vm822_vm1, %v1976_v0, 0.0  ;;  %v937_v22 = vsel %vm822_vm1, %v1980_v6, 0.0 }
 0x27a   : > { %v885_v11 = vsub.f32 %v2508_v7, %v867_v10  ;;  %1866 = vmatprep.subr.msk.bf16.mxu0 %vm2531_vm2, %v1864_v9  ;;  %1991 = vpow2.f32 %v907_v2  ;;  %v1377_v59 = vadd.s32 4294967288, %v1372_v55  ;;  %v1384_v62 = vadd.s32 4294967280, %v1372_v55 }
 0x27b   : > { %v1982_v12 = vpop.eup %1981  ;;  %v909_v13 = vmul.f32 1.442695, %v882_v61  ;;  %1869 = vmatpush3.bf16.xpose.msk.msra.mxu0 %vm2531_vm2, %v1864_v9  ;;  %v2603_v63 = vsub.s32 %v1372_v55, %v1374_v58  ;;  %v1391_v61 = vadd.s32 4294967272, %v1372_v55 }
 0x27c   : > { %v915_v14 = vmul.f32 1.442695, %v885_v11  ;;  %v870_v15 = vpop.xlane.xlu1 %869  ;;  %v940_v16 = vsel %vm822_vm1, %v1982_v12, 0.0  ;;  %v1876_v17 = vpack.c.bf16 %v1982_v12, %v1980_v6  ;;  %v1984_v18 = vpop.eup %1983  ;;  %v2605_v1 = vsub.s32 %v1377_v59, %v1374_v58 }
 0x27d   : > { %1993 = vpow2.f32 %v909_v13  ;;  %v886_v7 = vsub.f32 %v2504_v5, %v870_v15  ;;  %941 = vadd.xlane.f32.xlu1 %v940_v16  ;;  %926 = vadd.xlane.f32.xlu0 %v925_v4  ;;  %v943_v23 = vsel %vm822_vm1, %v1984_v18, 0.0  ;;  %v301_v5 = vld [vmem:[%s2519_s22 + $0x20] sm:$0xff]  ;;  %v2607_v3 = vsub.s32 %v1384_v62, %v1374_v58 }
 0x27e   : > { %1878 = vmatprep.subr.msk.bf16.mxu1 %vm2531_vm2, %v1876_v17  ;;  %1995 = vpow2.f32 %v915_v14  ;;  %v2612_v16 = vsub.s32 %v1391_v61, %v1374_v58 }
 0x27f   : > { %v1986_v19 = vpop.eup %1985  ;;  %v917_v20 = vmul.f32 1.442695, %v886_v7  ;;  %1881 = vmatpush3.bf16.xpose.msk.msra.mxu1 %vm2531_vm2, %v1876_v17 }
 0x280   : > { %v1882_v24 = vpack.c.bf16 %v1986_v19, %v1984_v18  ;;  %v1988_v25 = vpop.eup %1987  ;;  %v946_v28 = vsel %vm822_vm1, %v1986_v19, 0.0 }
 0x281   : > { %1997 = vpow2.f32 %v917_v20  ;;  %938 = vadd.xlane.f32.xlu1 %v937_v22  ;;  %944 = vadd.xlane.f32.xlu0 %v943_v23  ;;  %v955_v29 = vsel %vm822_vm1, %v1988_v25, 0.0 }
 0x282   : > { %1807 = vmatmul.mubr.msk.f32.vlgmr.msra.gmra.mrb[8].mxu0 %vm822_vm1, %v298_v21  ;;  %1884 = vmatprep.subr.msk.bf16.mxu0 %vm2531_vm2, %v1882_v24 }
 0x283   : > { %v1990_v26 = vpop.eup %1989  ;;  %1887 = vmatpush3.bf16.xpose.msk.msra.mxu0 %vm2531_vm2, %v1882_v24  ;;  %1828 = vmatprep.mubr.msk.f32.mxu0 %vm822_vm1, %v301_v5 }
 0x284   : > { %v1894_v30 = vpack.c.bf16 %v1990_v26, %v1988_v25  ;;  %v1992_v32 = vpop.eup %1991  ;;  %v958_v34 = vsel %vm822_vm1, %v1990_v26, 0.0 }
 0x285   : > { %947 = vadd.xlane.f32.xlu1 %v946_v28  ;;  %956 = vadd.xlane.f32.xlu0 %v955_v29  ;;  %v949_v35 = vsel %vm822_vm1, %v1992_v32, 0.0 }
 0x286   : > { %1818 = vmatmul.mubr.msk.f32.vlgmr.msra.gmra.mrb[8].mxu1 %vm822_vm1, %v300_v27  ;;  %1896 = vmatprep.subr.msk.bf16.mxu1 %vm2531_vm2, %v1894_v30 }
 0x287   : > { %v1994_v33 = vpop.eup %1993  ;;  %1899 = vmatpush3.bf16.xpose.msk.msra.mxu1 %vm2531_vm2, %v1894_v30  ;;  %1839 = vmatprep.mubr.msk.f32.mxu1 %vm822_vm1, %v303_v31 }
 0x288   : > { %v1888_v36 = vpack.c.bf16 %v1994_v33, %v1992_v32  ;;  %v1996_v37 = vpop.eup %1995  ;;  %v952_v40 = vsel %vm822_vm1, %v1994_v33, 0.0 }
 0x289   : > { %959 = vadd.xlane.f32.xlu1 %v958_v34  ;;  %950 = vadd.xlane.f32.xlu0 %v949_v35  ;;  %v961_v41 = vsel %vm822_vm1, %v1996_v37, 0.0 }
 0x28a   : > { %1890 = vmatprep.subr.msk.bf16.mxu0 %vm2531_vm2, %v1888_v36 }
 0x28b   : > { %v1998_v38 = vpop.eup %1997  ;;  %1893 = vmatpush3.bf16.xpose.msk.msra.mxu0 %vm2531_vm2, %v1888_v36 }
 0x28c   : > { %v1900_v42 = vpack.c.bf16 %v1998_v38, %v1996_v37  ;;  %v964_v44 = vsel %vm822_vm1, %v1998_v38, 0.0 }
 0x28d   : > { %953 = vadd.xlane.f32.xlu0 %v952_v40  ;;  %962 = vadd.xlane.f32.xlu1 %v961_v41 }
 0x28e   : > { %1902 = vmatprep.subr.msk.bf16.mxu1 %vm2531_vm2, %v1900_v42 }
 0x28f   : > { %1905 = vmatpush3.bf16.xpose.msk.msra.mxu1 %vm2531_vm2, %v1900_v42 }
 0x291   : > { %965 = vadd.xlane.f32.xlu1 %v964_v44 }
 0x292   : > { %1829 = vmatmul.mubr.msk.f32.vlgmr.msra.gmra.mrb[10].mxu0 %vm822_vm1, %v302_v43 }
 0x296   : > { %1840 = vmatmul.mubr.msk.f32.vlgmr.msra.gmra.mrb[10].mxu1 %vm822_vm1, %v304_v45 }
 0x2fa   : > { %v924_v47 = vpop.xlane.xlu1 %923 }
 0x2fb   : > { %v921_v46 = vpop.xlane.xlu0 %920  ;;  %1999 = vrcp.f32 %v924_v47 }
 0x2fc   : > { %2001 = vrcp.f32 %v921_v46 }
 0x2fe   : > { %v936_v49 = vpop.xlane.xlu1 %935 }
 0x302   : > { %v933_v48 = vpop.xlane.xlu0 %932 }
 0x305   : > { %v2000_v0 = vpop.eup %1999 }
 0x306   : > { %v930_v50 = vpop.xlane.xlu0 %929  ;;  %v2002_v2 = vpop.eup %2001  ;;  %v1381_v11 = vrot.slane %v2000_v0, %v2605_v1 }
 0x307   : > { %v1376_v6 = vrot.slane %v2002_v2, %v2603_v63 }
 0x309   : > { %v1383_v18 = vsel %vm1382_vm3, %v1381_v11, %v1376_v6 }
 0x30a   : > { %v942_v51 = vpop.xlane.xlu1 %941  ;;  %v927_v52 = vpop.xlane.xlu0 %926 }
 0x30b   : > { %2003 = vrcp.f32 %v927_v52 }
 0x30c   : > { %2005 = vrcp.f32 %v936_v49 }
 0x30d   : > { %2007 = vrcp.f32 %v933_v48 }
 0x30e   : > { %v939_v53 = vpop.xlane.xlu1 %938  ;;  %v945_v39 = vpop.xlane.xlu0 %944 }
 0x30f   : > { %2009 = vrcp.f32 %v939_v53 }
 0x310   : > { %2011 = vrcp.f32 %v930_v50 }
 0x311   : > { %2013 = vrcp.f32 %v942_v51 }
 0x312   : > { %v948_v56 = vpop.xlane.xlu1 %947  ;;  %v957_v57 = vpop.xlane.xlu0 %956  ;;  %2015 = vrcp.f32 %v945_v39 }
 0x313   : > { %2017 = vrcp.f32 %v948_v56 }
 0x315   : > { %v2004_v8 = vpop.eup %2003 }
 0x316   : > { %v960_v60 = vpop.xlane.xlu1 %959  ;;  %v951_v9 = vpop.xlane.xlu0 %950  ;;  %v1388_v13 = vrot.slane %v2004_v8, %v2607_v3 }
 0x317   : > { %v2006_v10 = vpop.eup %2005  ;;  %2019 = vrcp.f32 %v951_v9 }
 0x318   : > { %v2008_v12 = vpop.eup %2007  ;;  %v1390_v19 = vsel %vm1389_vm4, %v1388_v13, %v1383_v18  ;;  %v1405_v22 = vrot.slane %v2006_v10, %v2605_v1 }
 0x319   : > { %v2010_v14 = vpop.eup %2009  ;;  %v1401_v7 = vrot.slane %v2008_v12, %v2603_v63 }
 0x31a   : > { %v963_v15 = vpop.xlane.xlu1 %962  ;;  %v2012_v4 = vpop.eup %2011  ;;  %v1410_v20 = vrot.slane %v2010_v14, %v2607_v3 }
 0x31b   : > { %v954_v17 = vpop.xlane.xlu0 %953  ;;  %v1395_v21 = vrot.slane %v2012_v4, %v2612_v16  ;;  %v2014_v23 = vpop.eup %2013  ;;  %v1406_v26 = vsel %vm1382_vm3, %v1405_v22, %v1401_v7 }
 0x31c   : > { %2021 = vrcp.f32 %v954_v17  ;;  %v1411_v29 = vsel %vm1389_vm4, %v1410_v20, %v1406_v26  ;;  %v1415_v31 = vrot.slane %v2014_v23, %v2612_v16  ;;  %v2016_v36 = vpop.eup %2015 }
 0x31d   : > { %2023 = vrcp.f32 %v957_v57  ;;  %v1397_v25 = vsel %vm1396_vm5, %v1395_v21, %v1390_v19  ;;  %v2018_v38 = vpop.eup %2017  ;;  %v1420_v47 = vrot.slane %v2016_v36, %v2603_v63 }
 0x31e   : > { %v966_v24 = vpop.xlane.xlu1 %965  ;;  %2025 = vrcp.f32 %v960_v60  ;;  %v1416_v33 = vsel %vm1396_vm5, %v1415_v31, %v1411_v29  ;;  %v1424_v43 = vrot.slane %v2018_v38, %v2605_v1 }
 0x31f   : > { %2027 = vrcp.f32 %v963_v15 }
 0x320   : > { %2029 = vrcp.f32 %v966_v24  ;;  %v1425_v50 = vsel %vm1382_vm3, %v1424_v43, %v1420_v47 }
 0x321   : > { %v2020_v40 = vpop.eup %2019 }
 0x322   : > { %v1429_v45 = vrot.slane %v2020_v40, %v2607_v3 }
 0x324   : > { %v1430_v52 = vsel %vm1389_vm4, %v1429_v45, %v1425_v50 }
 0x326   : > { %v2022_v41 = vpop.eup %2021 }
 0x327   : > { %v2024_v42 = vpop.eup %2023  ;;  %v1434_v48 = vrot.slane %v2022_v41, %v2612_v16 }
 0x328   : > { %v2026_v44 = vpop.eup %2025  ;;  %v1439_v55 = vrot.slane %v2024_v42, %v2603_v63 }
 0x329   : > { %v2028_v46 = vpop.eup %2027  ;;  %v1443_v51 = vrot.slane %v2026_v44, %v2605_v1  ;;  %v1435_v39 = vsel %vm1396_vm5, %v1434_v48, %v1430_v52 }
 0x32a   : > { %v2030_v49 = vpop.eup %2029  ;;  %v1448_v53 = vrot.slane %v2028_v46, %v2607_v3 }
 0x32b   : > { %v1453_v56 = vrot.slane %v2030_v49, %v2612_v16  ;;  %v1444_v62 = vsel %vm1382_vm3, %v1443_v51, %v1439_v55 }
 0x32c   : > { %v1449_v0 = vsel %vm1389_vm4, %v1448_v53, %v1444_v62 }
 0x32d   : > { %v1454_v63 = vsel %vm1396_vm5, %v1453_v56, %v1449_v0 }
 0x355   : > { %v1808_v5 = vpop.f32.mrb[8].mxu0 }
 0x356   : > { %v1490_v27 = vmul.f32 %v1808_v5, %v1397_v25  ;;  %v1051_v28 = vpop.f32.mrb[9].mxu0 }
 0x357   : > { %v1489_v30 = vmul.f32 %v1397_v25, %v1051_v28 }
 0x358   : > { %1498 = vst.msk [vmem:[%s2625_s7 + $0x8] sm:$0xff] %vm822_vm1, %v1490_v27 }
 0x359   : > { %1497 = vst.msk [vmem:[%s2625_s7] sm:$0xff] %vm822_vm1, %v1489_v30  ;;  %v1819_v32 = vpop.f32.mrb[8].mxu1 }
 0x35a   : > { %v1492_v34 = vmul.f32 %v1819_v32, %v1416_v33  ;;  %v1144_v35 = vpop.f32.mrb[9].mxu1 }
 0x35b   : > { %v1491_v37 = vmul.f32 %v1416_v33, %v1144_v35 }
 0x35c   : > { %1500 = vst.msk [vmem:[%s2625_s7 + $0x18] sm:$0xff] %vm822_vm1, %v1492_v34 }
 0x35d   : > { %1499 = vst.msk [vmem:[%s2625_s7 + $0x10] sm:$0xff] %vm822_vm1, %v1491_v37 }
 0x365   : > { %v1830_v54 = vpop.f32.mrb[10].mxu0 }
 0x366   : > { %v1494_v57 = vmul.f32 %v1830_v54, %v1435_v39  ;;  %v1237_v58 = vpop.f32.mrb[11].mxu0 }
 0x367   : > { %v1493_v59 = vmul.f32 %v1435_v39, %v1237_v58 }
 0x368   : > { %1502 = vst.msk [vmem:[%s2625_s7 + $0x28] sm:$0xff] %vm822_vm1, %v1494_v57 }
 0x369   : > { %1501 = vst.msk [vmem:[%s2625_s7 + $0x20] sm:$0xff] %vm822_vm1, %v1493_v59  ;;  %v1841_v60 = vpop.f32.mrb[10].mxu1 }
 0x36a   : > { %v1496_v1 = vmul.f32 %v1841_v60, %v1454_v63  ;;  %v1330_v2 = vpop.f32.mrb[11].mxu1 }
 0x36b   : > { %v1495_v3 = vmul.f32 %v1454_v63, %v1330_v2 }
 0x36c   : > { %1504 = vst.msk [vmem:[%s2625_s7 + $0x38] sm:$0xff] %vm822_vm1, %v1496_v1 }
 0x36d   : > { %1503 = vst.msk [vmem:[%s2625_s7 + $0x30] sm:$0xff] %vm822_vm1, %v1495_v3 }
 0x36e   : > { %2134 = shalt.err (!%p2131_p10)
}
 0x36f   : > { %s2135_s20 = scalar_lea.hbm %s2659_s5, 1024  ;;  %s2139_s9 = scalar_lea.hbm %s2712_s3, 2048 }
 0x370   : > { %p2136_p11 = scmp.ne.s32.totalorder %s2659_s5, %s2135_s20  ;;  %p2140_p5 = scmp.lt.u32.totalorder %s2659_s5, %s2712_s3 }
 0x371   : > { %p2141_p2 = scmp.lt.u32.totalorder %s2139_s9, %s2135_s20  ;;  %p2143_p13 = scmp.lt.u32.totalorder %s2135_s20, %s2659_s5 }
 0x372   : > { %p2137_p4 = pnand %p2136_p11, %p2734_p7 }
 0x373   : > { %p2142_p1 = por %p2141_p2, %p2140_p5 }
 0x374   : > { %p2138_p3 = pneg %p2137_p4 }
 0x375   : > { %p2144_p6 = por %p2143_p13, %p2142_p1 }
 0x377   : > { %p2145_p9 = pnand %p2144_p6, %p2138_p3 }
 0x379   : > { %2148 = shalt.err (!%p2145_p9)
}
 0x37a   : > { %s2199_s17 = smov 128   ;;  %s2200_s22 = smov 8  }
 0x37b   : > { %1912 = dma.vmem_to_hbm [thread:$0]  (%p2734_p7), %s2661_s11, 1024, %s2659_s5, %s1506_s16, %s2199_s17, %s2199_s17, %s2200_s22  }
 0x37c PF: > { %s1535_s7 = sand.u32 1, %s2179_s12   ;;  %p2735_p12 = scmp.ne.s32.totalorder %s2722_s24, 0 }
 0x37d   : > { %p2736_p0 = scmp.ge.s32.totalorder %s2191_s15, 2  ;;  %s1536_s4 = scalar_lea.sflag [#allocation4], %s1535_s7 }
 0x37f   : > { %p1925_p8 = pnand %p2736_p0, %p2735_p12 }
 0x381   : > { %2174 = dma.done.wait (!%p1925_p8), %s1536_s4, 1024  }
 0x382   : > { %2176 = vsyncadd (!%p1925_p8), %s1536_s4, 4294966272  ;;  %p19_p10 = scmp.ge.s32.totalorder %s2246_s18, 4   ;;  %s2737_s12 = smov %s2183_s13 }
 0x383   : > { %s2738_s13 = smov %s2187_s14  ;;  %s2739_s14 = smov %s2258_s21 }
 0x384   : > { %s2740_s15 = smov %s2246_s18  ;;  %21 = sbr.rel (!%p19_p10) target bundleno = 9 (0x9), region = 101 }
 0x38b   :  { %1541 = vsyncpa [#allocation3], 1 }
 0x38c   :  { %1543 = vsyncpa [#allocation3 + $0x1], 1 }
 0x38d   :  { %1544 = vsyncpa [#allocation6], 1 }
 0x38e   :  { %1546 = vsyncpa [#allocation6 + $0x1], 1 }
 0x38f   :  { %1547 = vsyncpa [#allocation4], 1 }
 0x390   :  { %1549 = vsyncpa [#allocation4 + $0x1], 1 }

</bundles_post_ra>
